<compile_context>
chip_gen: v7x
topology: tpu7x:2x2x1
jax: 0.10.0
libtpu: 0.0.40
codegen_flags: <defaults>
</compile_context>

<pallas_src>
import functools

import jax
import jax.numpy as jnp
from jax.experimental import pallas as pl
from jax.experimental.pallas import tpu as pltpu


def _elu_plus_one(x):
    # F.elu(x) + 1.0   (alpha = 1)
    return jnp.where(x > 0, x + 1.0, jnp.exp(jnp.minimum(x, 0.0)))


def _mqla_kernel(km_ref, va_ref, qm_ref, o_ref, kvaug_ref, *,
                 eps, num_heads, head_dim, dim):
    """Multi-query linear attention, one (batch, seq_tile) block per grid step.

    Ref shapes (leading 1 is the batch block):
      km_ref   : [1, S, dim]        shared-key features, pre-activation (full seq)
      va_ref   : [1, S, hd+1]       values augmented with a ones column (full seq)
      qm_ref   : [1, TS, nh*dim]    per-head query features, pre-activation (seq tile)
      o_ref    : [1, TS, nh*hd]     lane-dense output tile (= [1, TS, hidden])
      kvaug_ref: VMEM [dim, hd+1]   cached [kv | k_sum] for the current batch element
    """
    s_idx = pl.program_id(1)

    # kv_aug = kf^T @ [v | 1] = [ kv (dim x hd) | k_sum (dim x 1) ]
    # Computed once per batch element, reused by every seq tile of that batch.
    @pl.when(s_idx == 0)
    def _():
        kf = _elu_plus_one(km_ref[0])                       # [S, dim]
        kvaug_ref[...] = jax.lax.dot_general(
            kf, va_ref[0],
            dimension_numbers=(((0,), (0,)), ((), ())),     # contract over S
            preferred_element_type=jnp.float32)             # [dim, hd+1]

    qf = _elu_plus_one(qm_ref[0])                           # [TS, nh*dim]
    kv_aug = kvaug_ref[...]                                 # [dim, hd+1]

    outs = []
    for n in range(num_heads):                              # static unroll over heads
        qf_n = qf[:, n * dim:(n + 1) * dim]                 # [TS, dim]
        oa = jnp.dot(qf_n, kv_aug,
                     preferred_element_type=jnp.float32)    # [TS, hd+1]
        num = oa[:, :head_dim]                              # q . kv
        norm = oa[:, head_dim:head_dim + 1] + eps           # q . k_sum + eps
        outs.append(num * pl.reciprocal(norm, approx=True))

    # Lane-dense store of the whole [TS, hidden] tile (heads concatenated on
    # lanes, matching torch's output.transpose(1,2).reshape(B, S, hidden)).
    o_ref[0] = jnp.concatenate(outs, axis=-1).astype(o_ref.dtype)


def _choose_seq_tile(S, max_rows=512):
    if S <= max_rows:
        return S
    for ts in range(max_rows, 7, -1):          # prefer multiple-of-8 divisors
        if S % ts == 0 and ts % 8 == 0:
            return ts
    for ts in range(max_rows, 0, -1):
        if S % ts == 0:
            return ts
    return S


def _round_up(x, m):
    return (x + m - 1) // m * m


def _tile_bytes(rows, cols, itemsize=4):
    return _round_up(max(rows, 1), 8) * _round_up(max(cols, 1), 128) * itemsize


def multi_query_linear_attention(params, hidden_states, *, num_heads, dim, eps=1e-6):
    B, S, H = hidden_states.shape
    hd = H // num_heads
    assert hd * num_heads == H
    x = hidden_states
    hi = jax.lax.Precision.HIGHEST

    # --- fold q_map / k_map (bias-free) into the q / k projections (tiny, one-off) ---
    wq_r = params["wq"].reshape(num_heads, hd, H)                                # [nh, hd, H]
    wq_eff = jnp.einsum("dh,nhk->ndk", params["wq_map"], wq_r, precision=hi)     # [nh, dim, H]
    bq_eff = jnp.einsum("dh,nh->nd", params["wq_map"],
                        params["bq"].reshape(num_heads, hd), precision=hi)       # [nh, dim]
    wk_eff = jnp.einsum("dh,hk->dk", params["wk_map"], params["wk"], precision=hi)  # [dim, H]
    bk_eff = params["wk_map"] @ params["bk"]                                     # [dim]

    # --- plain-JAX glue: fused projections (pre-activation kernel features) ---
    qm = jnp.einsum("bsk,ndk->bsnd", x, wq_eff) + bq_eff                         # [B, S, nh, dim]
    km = jnp.einsum("bsk,dk->bsd", x, wk_eff) + bk_eff                           # [B, S, dim]
    v = x @ params["wv"].T + params["bv"]                                        # [B, S, hd]
    va = jnp.concatenate([v, jnp.ones((B, S, 1), v.dtype)], axis=-1)             # [B, S, hd+1]
    qm = qm.reshape(B, S, num_heads * dim)        # free reshape: heads stay on lanes

    ts = _choose_seq_tile(S)
    grid = (B, S // ts)

    # Explicit VMEM budget (double-buffered blocks + kv scratch), clamped.
    need = 2 * (_tile_bytes(S, dim) + _tile_bytes(S, hd + 1)
                + _tile_bytes(ts, num_heads * dim) + _tile_bytes(ts, H)) \
        + _tile_bytes(dim, hd + 1)
    vmem_limit = int(min(64 * 1024 * 1024,
                         max(16 * 1024 * 1024, 2 * need + (2 << 20))))

    kernel = functools.partial(_mqla_kernel, eps=eps, num_heads=num_heads,
                               head_dim=hd, dim=dim)
    out = pl.pallas_call(
        kernel,
        out_shape=jax.ShapeDtypeStruct((B, S, H), jnp.float32),
        grid=grid,
        in_specs=[
            pl.BlockSpec((1, S, dim), lambda b, s: (b, 0, 0)),              # km (full seq)
            pl.BlockSpec((1, S, hd + 1), lambda b, s: (b, 0, 0)),           # [v | 1] (full seq)
            pl.BlockSpec((1, ts, num_heads * dim), lambda b, s: (b, s, 0)), # qm tile
        ],
        out_specs=pl.BlockSpec((1, ts, H), lambda b, s: (b, s, 0)),
        scratch_shapes=[pltpu.VMEM((dim, hd + 1), jnp.float32)],
        compiler_params=pltpu.CompilerParams(
            dimension_semantics=("parallel", "arbitrary"),
            vmem_limit_bytes=vmem_limit),
    )(km, va, qm)                                                           # [B, S, H]

    # --- plain-JAX glue: output projection (no transposes needed) ---
    out = out @ params["wo"].T + params["bo"]
    # dropout: identity (inference mode)
    return out


def reference_forward(params, hidden_states, *, num_heads, dim, eps=1e-6):
    """Pure-JAX reference mirroring the PyTorch forward (non-causal, no mask)."""
    B, S, H = hidden_states.shape
    hd = H // num_heads
    q = hidden_states @ params["wq"].T + params["bq"]
    k = hidden_states @ params["wk"].T + params["bk"]
    v = hidden_states @ params["wv"].T + params["bv"]
    q = q.reshape(B, S, num_heads, hd)
    q = _elu_plus_one(jnp.einsum("bsnh,dh->bsnd", q, params["wq_map"]))   # [B,S,nh,dim]
    k = _elu_plus_one(jnp.einsum("bsh,dh->bsd", k, params["wk_map"]))     # [B,S,dim]
    q = q.transpose(0, 2, 1, 3)                                           # [B,nh,S,dim]
    kv = jnp.einsum("bsd,bsh->bdh", k, v)                                 # [B,dim,hd]
    ksum = k.sum(axis=1)                                                  # [B,dim]
    norm = jnp.einsum("bnsd,bd->bns", q, ksum) + eps                      # [B,nh,S]
    out = jnp.einsum("bnsd,bdh->bnsh", q, kv) / norm[..., None]           # [B,nh,S,hd]
    out = out.transpose(0, 2, 1, 3).reshape(B, S, H)
    return out @ params["wo"].T + params["bo"]


def init_params(key, hidden_size, num_heads, dim):
    hd = hidden_size // num_heads
    ks = jax.random.split(key, 6)

    def xavier(k, shape):  # torch Linear weight layout: [out_features, in_features]
        fan_out, fan_in = shape
        limit = (6.0 / (fan_in + fan_out)) ** 0.5
        return jax.random.uniform(k, shape, jnp.float32, -limit, limit)

    return {
        "wq": xavier(ks[0], (hidden_size, hidden_size)),
        "bq": jnp.zeros((hidden_size,), jnp.float32),
        "wk": xavier(ks[1], (hd, hidden_size)),
        "bk": jnp.zeros((hd,), jnp.float32),
        "wv": xavier(ks[2], (hd, hidden_size)),
        "bv": jnp.zeros((hd,), jnp.float32),
        "wo": xavier(ks[3], (hidden_size, hidden_size)),
        "bo": jnp.zeros((hidden_size,), jnp.float32),
        # q_map / k_map: Linear(head_dim, dim, bias=False), normal(std=dim**-0.5)
        "wq_map": jax.random.normal(ks[4], (dim, hd), jnp.float32) * dim ** -0.5,
        "wk_map": jax.random.normal(ks[5], (dim, hd), jnp.float32) * dim ** -0.5,
    }


if __name__ == "__main__":
    B, S, H = 2, 8, 32
    num_heads, dim = 4, 16

    key = jax.random.PRNGKey(0)
    pkey, xkey = jax.random.split(key)
    params = init_params(pkey, H, num_heads, dim)
    hidden_states = jax.random.normal(xkey, (B, S, H), jnp.float32)

    out = multi_query_linear_attention(params, hidden_states, num_heads=num_heads, dim=dim)
    out = jax.block_until_ready(out)

    ref = reference_forward(params, hidden_states, num_heads=num_heads, dim=dim)
    assert out.shape == (B, S, H), out.shape
    assert jnp.allclose(out, ref, rtol=2e-2, atol=2e-2), "kernel does not match reference"

    print("KERNEL_OK")
</pallas_src>

<mosaic_0001>
module attributes {stable_mosaic.version = 11 : i64} {
  func.func @_mqla_kernel(%arg0: i32, %arg1: i32, %arg2: memref<1x8x16xf32, #tpu.memory_space<vmem>>, %arg3: memref<1x8x9xf32, #tpu.memory_space<vmem>>, %arg4: memref<1x8x64xf32, #tpu.memory_space<vmem>>, %arg5: memref<1x8x32xf32, #tpu.memory_space<vmem>>, %arg6: memref<16x9xf32, #tpu.memory_space<vmem>>) attributes {dimension_semantics = [#tpu.dimension_semantics<parallel>, #tpu.dimension_semantics<arbitrary>], iteration_bounds = array<i64: 2, 1>, scalar_prefetch = 0 : i64, scratch_operands = 1 : i64, tpu.core_type = #tpu.core_type<tc>, window_params = [{transform_indices = @transform_0, window_bounds = array<i64: 1, 8, 16>}, {transform_indices = @transform_1, window_bounds = array<i64: 1, 8, 9>}, {transform_indices = @transform_2, window_bounds = array<i64: 1, 8, 64>}, {transform_indices = @transform_3, window_bounds = array<i64: 1, 8, 32>}]} {
    %c0_i32 = arith.constant 0 : i32
    %0 = arith.cmpi eq, %arg1, %c0_i32 : i32
    %1 = arith.extui %0 : i1 to i32
    %c0_i32_0 = arith.constant 0 : i32
    %2 = arith.cmpi ne, %1, %c0_i32_0 : i32
    scf.if %2 {
      %c0_18 = arith.constant 0 : index
      %c0_19 = arith.constant 0 : index
      %c0_20 = arith.constant 0 : index
      %54 = vector.load %arg2[%c0_18, %c0_19, %c0_20] : memref<1x8x16xf32, #tpu.memory_space<vmem>>, vector<1x8x16xf32>
      %55 = vector.shape_cast %54 : vector<1x8x16xf32> to vector<8x16xf32>
      %cst_21 = arith.constant 0.000000e+00 : f32
      %56 = vector.broadcast %cst_21 : f32 to vector<8x16xf32>
      %57 = arith.cmpf ogt, %55, %56 : vector<8x16xf32>
      %cst_22 = arith.constant 1.000000e+00 : f32
      %58 = vector.broadcast %cst_22 : f32 to vector<8x16xf32>
      %59 = arith.addf %55, %58 : vector<8x16xf32>
      %cst_23 = arith.constant 0.000000e+00 : f32
      %60 = vector.broadcast %cst_23 : f32 to vector<8x16xf32>
      %61 = arith.minimumf %55, %60 : vector<8x16xf32>
      %62 = math.exp %61 : vector<8x16xf32>
      %63 = arith.select %57, %59, %62 : vector<8x16xi1>, vector<8x16xf32>
      %c0_24 = arith.constant 0 : index
      %c0_25 = arith.constant 0 : index
      %c0_26 = arith.constant 0 : index
      %64 = vector.load %arg3[%c0_24, %c0_25, %c0_26] : memref<1x8x9xf32, #tpu.memory_space<vmem>>, vector<1x8x9xf32>
      %65 = vector.shape_cast %64 : vector<1x8x9xf32> to vector<8x9xf32>
      %cst_27 = arith.constant dense<0.000000e+00> : vector<16x9xf32>
      %66 = tpu.matmul %63, %65, %cst_27 {dimension_numbers = #tpu.dot_dimension_numbers<[0], [0], [1], [1], [0, 1, 1, 1], [], []>} : vector<8x16xf32>, vector<8x9xf32>, vector<16x9xf32> -> vector<16x9xf32>
      %c0_28 = arith.constant 0 : index
      %c0_29 = arith.constant 0 : index
      %67 = vector.load %arg6[%c0_28, %c0_29] : memref<16x9xf32, #tpu.memory_space<vmem>>, vector<16x9xf32>
      tpu.vector_store %arg6[%c0_28, %c0_29], %66 {strides = array<i32>} : memref<16x9xf32, #tpu.memory_space<vmem>>, vector<16x9xf32>,
    } else {
    }
    %c0 = arith.constant 0 : index
    %c0_1 = arith.constant 0 : index
    %c0_2 = arith.constant 0 : index
    %3 = vector.load %arg4[%c0, %c0_1, %c0_2] : memref<1x8x64xf32, #tpu.memory_space<vmem>>, vector<1x8x64xf32>
    %4 = vector.shape_cast %3 : vector<1x8x64xf32> to vector<8x64xf32>
    %cst = arith.constant 0.000000e+00 : f32
    %5 = vector.broadcast %cst : f32 to vector<8x64xf32>
    %6 = arith.cmpf ogt, %4, %5 : vector<8x64xf32>
    %cst_3 = arith.constant 1.000000e+00 : f32
    %7 = vector.broadcast %cst_3 : f32 to vector<8x64xf32>
    %8 = arith.addf %4, %7 : vector<8x64xf32>
    %cst_4 = arith.constant 0.000000e+00 : f32
    %9 = vector.broadcast %cst_4 : f32 to vector<8x64xf32>
    %10 = arith.minimumf %4, %9 : vector<8x64xf32>
    %11 = math.exp %10 : vector<8x64xf32>
    %12 = arith.select %6, %8, %11 : vector<8x64xi1>, vector<8x64xf32>
    %c0_5 = arith.constant 0 : index
    %c0_6 = arith.constant 0 : index
    %13 = vector.load %arg6[%c0_5, %c0_6] : memref<16x9xf32, #tpu.memory_space<vmem>>, vector<16x9xf32>
    %14 = vector.extract_strided_slice %12 {offsets = [0, 0], sizes = [8, 16], strides = [1, 1]} : vector<8x64xf32> to vector<8x16xf32>
    %cst_7 = arith.constant dense<0.000000e+00> : vector<8x9xf32>
    %15 = tpu.matmul %14, %13, %cst_7 {dimension_numbers = #tpu.dot_dimension_numbers<[1], [0], [0], [1], [0, 0, 1, 1], [], []>} : vector<8x16xf32>, vector<16x9xf32>, vector<8x9xf32> -> vector<8x9xf32>
    %16 = vector.extract_strided_slice %15 {offsets = [0, 0], sizes = [8, 8], strides = [1, 1]} : vector<8x9xf32> to vector<8x8xf32>
    %17 = vector.extract_strided_slice %15 {offsets = [0, 8], sizes = [8, 1], strides = [1, 1]} : vector<8x9xf32> to vector<8x1xf32>
    %cst_8 = arith.constant 9.99999997E-7 : f32
    %18 = vector.broadcast %cst_8 : f32 to vector<8x1xf32>
    %19 = arith.addf %17, %18 : vector<8x1xf32>
    %20 = tpu.reciprocal %19 {approx = true} : vector<8x1xf32> -> vector<8x1xf32>
    %21 = vector.broadcast %20 : vector<8x1xf32> to vector<8x8xf32>
    %22 = arith.mulf %16, %21 : vector<8x8xf32>
    %23 = vector.extract_strided_slice %12 {offsets = [0, 16], sizes = [8, 16], strides = [1, 1]} : vector<8x64xf32> to vector<8x16xf32>
    %cst_9 = arith.constant dense<0.000000e+00> : vector<8x9xf32>
    %24 = tpu.matmul %23, %13, %cst_9 {dimension_numbers = #tpu.dot_dimension_numbers<[1], [0], [0], [1], [0, 0, 1, 1], [], []>} : vector<8x16xf32>, vector<16x9xf32>, vector<8x9xf32> -> vector<8x9xf32>
    %25 = vector.extract_strided_slice %24 {offsets = [0, 0], sizes = [8, 8], strides = [1, 1]} : vector<8x9xf32> to vector<8x8xf32>
    %26 = vector.extract_strided_slice %24 {offsets = [0, 8], sizes = [8, 1], strides = [1, 1]} : vector<8x9xf32> to vector<8x1xf32>
    %cst_10 = arith.constant 9.99999997E-7 : f32
    %27 = vector.broadcast %cst_10 : f32 to vector<8x1xf32>
    %28 = arith.addf %26, %27 : vector<8x1xf32>
    %29 = tpu.reciprocal %28 {approx = true} : vector<8x1xf32> -> vector<8x1xf32>
    %30 = vector.broadcast %29 : vector<8x1xf32> to vector<8x8xf32>
    %31 = arith.mulf %25, %30 : vector<8x8xf32>
    %32 = vector.extract_strided_slice %12 {offsets = [0, 32], sizes = [8, 16], strides = [1, 1]} : vector<8x64xf32> to vector<8x16xf32>
    %cst_11 = arith.constant dense<0.000000e+00> : vector<8x9xf32>
    %33 = tpu.matmul %32, %13, %cst_11 {dimension_numbers = #tpu.dot_dimension_numbers<[1], [0], [0], [1], [0, 0, 1, 1], [], []>} : vector<8x16xf32>, vector<16x9xf32>, vector<8x9xf32> -> vector<8x9xf32>
    %34 = vector.extract_strided_slice %33 {offsets = [0, 0], sizes = [8, 8], strides = [1, 1]} : vector<8x9xf32> to vector<8x8xf32>
    %35 = vector.extract_strided_slice %33 {offsets = [0, 8], sizes = [8, 1], strides = [1, 1]} : vector<8x9xf32> to vector<8x1xf32>
    %cst_12 = arith.constant 9.99999997E-7 : f32
    %36 = vector.broadcast %cst_12 : f32 to vector<8x1xf32>
    %37 = arith.addf %35, %36 : vector<8x1xf32>
    %38 = tpu.reciprocal %37 {approx = true} : vector<8x1xf32> -> vector<8x1xf32>
    %39 = vector.broadcast %38 : vector<8x1xf32> to vector<8x8xf32>
    %40 = arith.mulf %34, %39 : vector<8x8xf32>
    %41 = vector.extract_strided_slice %12 {offsets = [0, 48], sizes = [8, 16], strides = [1, 1]} : vector<8x64xf32> to vector<8x16xf32>
    %cst_13 = arith.constant dense<0.000000e+00> : vector<8x9xf32>
    %42 = tpu.matmul %41, %13, %cst_13 {dimension_numbers = #tpu.dot_dimension_numbers<[1], [0], [0], [1], [0, 0, 1, 1], [], []>} : vector<8x16xf32>, vector<16x9xf32>, vector<8x9xf32> -> vector<8x9xf32>
    %43 = vector.extract_strided_slice %42 {offsets = [0, 0], sizes = [8, 8], strides = [1, 1]} : vector<8x9xf32> to vector<8x8xf32>
    %44 = vector.extract_strided_slice %42 {offsets = [0, 8], sizes = [8, 1], strides = [1, 1]} : vector<8x9xf32> to vector<8x1xf32>
    %cst_14 = arith.constant 9.99999997E-7 : f32
    %45 = vector.broadcast %cst_14 : f32 to vector<8x1xf32>
    %46 = arith.addf %44, %45 : vector<8x1xf32>
    %47 = tpu.reciprocal %46 {approx = true} : vector<8x1xf32> -> vector<8x1xf32>
    %48 = vector.broadcast %47 : vector<8x1xf32> to vector<8x8xf32>
    %49 = arith.mulf %43, %48 : vector<8x8xf32>
    %50 = tpu.concatenate %22, %31, %40, %49 in 1 : vector<8x8xf32>, vector<8x8xf32>, vector<8x8xf32>, vector<8x8xf32> -> vector<8x32xf32>
    %c0_15 = arith.constant 0 : index
    %c0_16 = arith.constant 0 : index
    %c0_17 = arith.constant 0 : index
    %51 = vector.load %arg5[%c0_15, %c0_16, %c0_17] : memref<1x8x32xf32, #tpu.memory_space<vmem>>, vector<1x8x32xf32>
    %52 = vector.shape_cast %51 : vector<1x8x32xf32> to vector<8x32xf32>
    %53 = vector.shape_cast %50 : vector<8x32xf32> to vector<1x8x32xf32>
    tpu.vector_store %arg5[%c0_15, %c0_16, %c0_17], %53 {strides = array<i32>} : memref<1x8x32xf32, #tpu.memory_space<vmem>>, vector<1x8x32xf32>,
    return
  }
  func.func @transform_0(%arg0: i32, %arg1: i32) -> (i32, i32, i32) {
    %c0_i32 = arith.constant 0 : i32
    %c0_i32_0 = arith.constant 0 : i32
    %c0_i32_1 = arith.constant 0 : i32
    return %arg0, %c0_i32, %c0_i32_0 : i32, i32, i32
  }
  func.func @transform_1(%arg0: i32, %arg1: i32) -> (i32, i32, i32) {
    %c0_i32 = arith.constant 0 : i32
    %c0_i32_0 = arith.constant 0 : i32
    %c0_i32_1 = arith.constant 0 : i32
    return %arg0, %c0_i32, %c0_i32_0 : i32, i32, i32
  }
  func.func @transform_2(%arg0: i32, %arg1: i32) -> (i32, i32, i32) {
    %c0_i32 = arith.constant 0 : i32
    %c0_i32_0 = arith.constant 0 : i32
    return %arg0, %arg1, %c0_i32 : i32, i32, i32
  }
  func.func @transform_3(%arg0: i32, %arg1: i32) -> (i32, i32, i32) {
    %c0_i32 = arith.constant 0 : i32
    %c0_i32_0 = arith.constant 0 : i32
    return %arg0, %arg1, %c0_i32 : i32, i32, i32
  }
}

</mosaic_0001>

<bundles_post_ra>
// kernel: tpu_custom_call.1
= control target key start
LH: loop header
LB: loop body
LE: loop exit
PB: predicated region body
PF: predicated region fallthrough
CT: control target
= control target key end

     0   :  { %s1566_s0 = inlined_call_operand.hbm [shape: f32[2,8,16], index: 0, kind: input, shape index: {}]   ;;  %s1567_s1 = inlined_call_operand.hbm [shape: f32[2,8,9], index: 1, kind: input, shape index: {}]   ;;  %s1568_s2 = inlined_call_operand.hbm [shape: f32[2,8,64], index: 2, kind: input, shape index: {}]   ;;  %s1569_s3 = inlined_call_operand.hbm [shape: f32[2,8,32], index: 3, kind: output, shape index: {}]  }
   0x1   :  { %1575 = sst [smem:[#allocation16_spill]] %s1567_s1 }
   0x2   :  { %8 = vsyncpa [#allocation4], 0 }
   0x3   :  { %10 = vsyncpa [#allocation4 + $0x1], 0 }
   0x4   :  { %11 = vsyncpa [#allocation7], 0 }
   0x5   :  { %13 = vsyncpa [#allocation7 + $0x1], 0 }
   0x6   :  { %14 = vsyncpa [#allocation5], 0 }
   0x7   :  { %16 = vsyncpa [#allocation5 + $0x1], 0  ;;  %s1290_s12 = smov 0   ;;  %s1292_s13 = smov 0  }
   0x8   :  { %s1294_s14 = smov 0   ;;  %s1296_s15 = smov 0  }
   0x9   :  { %s1298_s16 = smov 0   ;;  %s1300_s17 = smov 0  }
   0xa LB: > { %1576 = sst [smem:[#allocation13_spill]] %s1250_s16  ;;  %s1321_s18 = sadd.s32 4294967295, %s1254_s17   ;;  %s1254_s17 = sphi %s1300_s17, %s22_s17   ;;  %s1250_s16 = sphi %s1298_s16, %s1597_s16   ;;  %s1246_s15 = sphi %s1296_s15, %s1596_s15   ;;  %s1242_s14 = sphi %s1294_s14, %s1600_s14   ;;  %s1238_s13 = sphi %s1292_s13, %s1599_s13   ;;  %s1234_s12 = sphi %s1290_s12, %s1598_s12  }
   0xb   : > { %s898_s19 = sadd.s32 4294967294, %s1254_s17   ;;  %s34_s20 = sadd.s32 1, %s1250_s16 }
   0xc   : > { %s41_s21 = sadd.s32 1, %s1242_s14  ;;  %p36_p0 = scmp.ge.s32.totalorder %s34_s20, 2 }
   0xd   : > { %p48_p1 = scmp.ne.s32.totalorder %s1242_s14, %s1238_s13  ;;  %p49_p2 = scmp.eq.s32.totalorder %s1254_s17, 0 }
   0xe   : > { %p54_p3 = scmp.ne.s32.totalorder %s1238_s13, %s1234_s12  ;;  %s1602_s20 = smov (%p36_p0, %s34_s20), 0 }
   0xf   : > { %1577 = sst [smem:[#allocation14_spill]] %s1602_s20  ;;  %p1333_p4 = por %p49_p2, %p48_p1 }
  0x10   : > { %p55_p5 = scmp.eq.s32.totalorder %s1321_s18, 0  ;;  %s38_s23 = ssub.s32 %s1250_s16, %s1602_s20 }
  0x11   : > { %p134_p6 = scmp.eq.s32.totalorder %s1321_s18, 1  ;;  %p39_p7 = scmp.eq.s32.totalorder %s38_s23, 0 }
  0x12   : > { %p1341_p8 = por %p55_p5, %p54_p3  ;;  %p140_p10 = scmp.eq.s32.totalorder %s898_s19, 1 }
  0x13   : > { %p1345_p9 = por %p134_p6, %p48_p1  ;;  %p1004_p13 = scmp.lt.s32.totalorder %s1254_s17, 2 }
  0x14   : > { %s1579_s24 = scalar_select %p1341_p8, 1, 0 }
  0x15   : > { %s1580_s25 = scalar_select %p1345_p9, 1, 0 }
  0x16   : > { %s1350_s26 = scalar_select %p39_p7, %s1242_s14, %s41_s21  }
  0x17   : > { %p1352_p11 = por %p140_p10, %p54_p3  ;;  %s160_s28 = sand.u32 1, %s1242_s14  }
  0x18   : > { %1581 = sst [smem:[#allocation15_spill]] %s1350_s26  ;;  %s1361_s29 = sshll.u32 %s160_s28, 3 }
  0x19   : > { %s1582_s27 = scalar_select %p1352_p11, 1, 0 }
  0x1a   : > { %s1364_s30 = sshll.u32 %s1250_s16, 7  ;;  %p1368_p0 = pnand %p1004_p13, %p1333_p4 }
  0x1b   : > { %s178_s5 = sand.u32 1, %s1254_s17   ;;  %s1584_s1 = sld [smem:[#allocation16_spill]] }
  0x1c   : > { %s1583_s4 = scalar_select %p1368_p0, 1, 0 }
  0x1d   : > { %s182_s9 = scalar_lea.vmem [#allocation6], %s1361_s29  ;;  %s1384_s11 = scalar_lea.sflag [#allocation7], %s178_s5 }
  0x1e   : > { %s189_s10 = sshll.u32 %s182_s9, 4  ;;  %p1390_p4 = pneg %p1368_p0  ;;  %s1381_s10 = int_to_ptr.vmem [resolvable:$true] %s189_s10 }
  0x21   : > { %s1377_s8 = scalar_lea.hbm %s1584_s1, %s1364_s30  ;;  %s1083_s6 = scalar_lea.hbm %s1584_s1, 256 }
  0x22   : > { %s1078_s19 = scalar_lea.hbm %s1377_s8, 128  ;;  %p1084_p7 = scmp.lt.u32.totalorder %s1377_s8, %s1584_s1 }
  0x23   : > { %p1079_p3 = scmp.ne.s32.totalorder %s1377_s8, %s1078_s19  ;;  %p1085_p10 = scmp.lt.u32.totalorder %s1083_s6, %s1078_s19 }
  0x24   : > { %p1087_p12 = scmp.lt.u32.totalorder %s1078_s19, %s1377_s8 }
  0x25   : > { %p1081_p5 = pnand %p1390_p4, %p1079_p3  ;;  %p1086_p13 = por %p1085_p10, %p1084_p7 }
  0x27   : > { %p1082_p6 = pneg %p1081_p5  ;;  %p1088_p1 = por %p1087_p12, %p1086_p13 }
  0x29   : > { %p1089_p2 = pnand %p1088_p1, %p1082_p6 }
  0x2b   : > { %1092 = shalt.err (!%p1089_p2)
}
  0x2c   : > { %s1093_s5 = scalar_lea.vmem %s1381_s10, 128  ;;  %s1256_s22 = smov [#allocation6]  }
  0x2d   : > { %p1094_p3 = scmp.ne.s32.totalorder %s1381_s10, %s1093_s5  ;;  %s1098_s23 = sshll.u32 %s1256_s22, 4  ;;  %s1099_s23 = int_to_ptr.vmem [resolvable:$false] %s1098_s23 }
  0x2e   : > { %s1100_s7 = scalar_lea.vmem %s1099_s23, 256  ;;  %p1101_p9 = scmp.lt.s32.totalorder %s1381_s10, %s1099_s23 }
  0x2f   : > { %p1096_p5 = pnand %p1094_p3, %p1390_p4  ;;  %p1102_p8 = scmp.lt.s32.totalorder %s1100_s7, %s1093_s5 }
  0x31   : > { %p1097_p11 = pneg %p1096_p5  ;;  %p1103_p7 = por %p1102_p8, %p1101_p9 }
  0x33   : > { %p1104_p10 = pnand %p1103_p7, %p1097_p11 }
  0x35   : > { %1107 = shalt.err (!%p1104_p10)
}
  0x36   : > { %996 = dma.hbm_to_vmem [thread:$0]  (!%p1368_p0), %s1377_s8, 128, %s1381_s10, %s1384_s11  }
  0x37   : > { %p1586_p12 = scmp.lt.s32.totalorder %s1254_s17, 3  ;;  %p1587_p1 = scmp.ge.s32.totalorder %s1254_s17, 1 }
  0x38   : > { %s1426_s5 = scalar_lea.hbm %s1566_s0, %s1364_s30  ;;  %s164_s22 = scalar_lea.vmem [#allocation3], %s1361_s29 }
  0x39   : > { %p1418_p2 = pnand %p1587_p1, %p1586_p12  ;;  %s171_s23 = sshll.u32 %s164_s22, 4  ;;  %s1429_s23 = int_to_ptr.vmem [resolvable:$true] %s171_s23 }
  0x3a   : > { %s1435_s7 = scalar_lea.hbm %s1568_s2, %s1364_s30  ;;  %s161_s1 = scalar_lea.sflag [#allocation4], %s160_s28 }
  0x3b   : > { %s1588_s19 = scalar_select %p1418_p2, 1, 0 }
  0x3c   : > { %s1108_s20 = scalar_lea.hbm %s1426_s5, 128  ;;  %s1113_s16 = scalar_lea.hbm %s1566_s0, 256 }
  0x3d   : > { %p1109_p8 = scmp.ne.s32.totalorder %s1426_s5, %s1108_s20  ;;  %p1114_p6 = scmp.lt.u32.totalorder %s1426_s5, %s1566_s0 }
  0x3e   : > { %p1115_p13 = scmp.lt.u32.totalorder %s1113_s16, %s1108_s20  ;;  %p1117_p5 = scmp.lt.u32.totalorder %s1108_s20, %s1426_s5 }
  0x3f   : > { %p1111_p9 = pnand %p1109_p8, %p1390_p4 }
  0x40   : > { %p1116_p3 = por %p1115_p13, %p1114_p6 }
  0x41   : > { %p1112_p11 = pneg %p1111_p9 }
  0x42   : > { %p1118_p7 = por %p1117_p5, %p1116_p3 }
  0x44   : > { %p1119_p10 = pnand %p1118_p7, %p1112_p11 }
  0x46   : > { %1122 = shalt.err (!%p1119_p10)
}
  0x47   : > { %s1123_s28 = scalar_lea.vmem %s1429_s23, 128  ;;  %s1257_s30 = smov [#allocation3]  }
  0x48   : > { %p1124_p12 = scmp.ne.s32.totalorder %s1429_s23, %s1123_s28  ;;  %s1128_s8 = sshll.u32 %s1257_s30, 4  ;;  %s1129_s8 = int_to_ptr.vmem [resolvable:$false] %s1128_s8 }
  0x49   : > { %s1130_s26 = scalar_lea.vmem %s1129_s8, 256  ;;  %p1131_p9 = scmp.lt.s32.totalorder %s1429_s23, %s1129_s8 }
  0x4a   : > { %p1126_p1 = pnand %p1124_p12, %p1390_p4  ;;  %p1132_p2 = scmp.lt.s32.totalorder %s1130_s26, %s1123_s28 }
  0x4c   : > { %p1127_p8 = pneg %p1126_p1  ;;  %p1133_p6 = por %p1132_p2, %p1131_p9 }
  0x4e   : > { %p1134_p13 = pnand %p1133_p6, %p1127_p8 }
  0x50   : > { %1137 = shalt.err (!%p1134_p13)
}
  0x51   : > { %993 = dma.hbm_to_vmem [thread:$0]  (!%p1368_p0), %s1426_s5, 128, %s1429_s23, %s161_s1  }
  0x52   : > { %s200_s16 = scalar_lea.vmem [#allocation8], %s1361_s29  ;;  %s1138_s10 = scalar_lea.hbm %s1435_s7, 128 }
  0x53   : > { %s208_s20 = sshll.u32 %s200_s16, 4  ;;  %p1139_p11 = scmp.ne.s32.totalorder %s1435_s7, %s1138_s10  ;;  %s209_s20 = int_to_ptr.vmem [resolvable:$true] %s208_s20 }
  0x54   : > { %s1143_s22 = scalar_lea.hbm %s1568_s2, 256  ;;  %p1144_p5 = scmp.lt.u32.totalorder %s1435_s7, %s1568_s2 }
  0x55   : > { %p1141_p2 = pnand %p1139_p11, %p1390_p4  ;;  %p1145_p7 = scmp.lt.u32.totalorder %s1143_s22, %s1138_s10 }
  0x56   : > { %p1147_p12 = scmp.lt.u32.totalorder %s1138_s10, %s1435_s7 }
  0x57   : > { %p1142_p3 = pneg %p1141_p2  ;;  %p1146_p10 = por %p1145_p7, %p1144_p5 }
  0x59   : > { %p1148_p1 = por %p1147_p12, %p1146_p10 }
  0x5b   : > { %p1149_p8 = pnand %p1148_p1, %p1142_p3 }
  0x5d   : > { %1152 = shalt.err (!%p1149_p8)
}
  0x5e   : > { %s1153_s1 = scalar_lea.vmem %s209_s20, 128  ;;  %s1258_s29 = smov [#allocation8]  }
  0x5f   : > { %p1154_p9 = scmp.ne.s32.totalorder %s209_s20, %s1153_s1  ;;  %s1158_s5 = sshll.u32 %s1258_s29, 4  ;;  %s1159_s5 = int_to_ptr.vmem [resolvable:$false] %s1158_s5 }
  0x60   : > { %s1160_s23 = scalar_lea.vmem %s1159_s5, 256  ;;  %p1161_p11 = scmp.lt.s32.totalorder %s209_s20, %s1159_s5 }
  0x61   : > { %p1156_p6 = pnand %p1154_p9, %p1390_p4  ;;  %p1162_p2 = scmp.lt.s32.totalorder %s1160_s23, %s1153_s1 }
  0x63   : > { %p1157_p13 = pneg %p1156_p6  ;;  %p1163_p0 = por %p1162_p2, %p1161_p11 }
  0x65   : > { %p1164_p5 = pnand %p1163_p0, %p1157_p13 }
  0x67   : > { %1167 = shalt.err (!%p1164_p5)
}
  0x68   : > { %p1589_p7 = scmp.ne.s32.totalorder %s1583_s4, 0  ;;  %p1590_p3 = scmp.ne.s32.totalorder %s1588_s19, 0 }
  0x69   : > { %s1482_s21 = sand.u32 (!%p1590_p3), 1, %s1238_s13   ;;  %p1591_p0 = scmp.ne.s32.totalorder (!%p1590_p3), %s1579_s24, 0 }
  0x6a   : > { %999 = dma.hbm_to_vmem [thread:$0]  (!%p1589_p7), %s1435_s7, 128, %s209_s20, %s1384_s11  }
  0x6b   : > { %217 = sbr.rel (%p1590_p3) target bundleno = 987 (0x3db), region = 32  ;;  %s1485_s8 = sshll.u32 (!%p1590_p3), %s1482_s21, 3 }
  0x6c   : > { %s220_s26 = scalar_lea.sflag (!%p1590_p3), [#allocation4], %s1482_s21  ;;  %s223_s16 = scalar_lea.vmem (!%p1590_p3), [#allocation3], %s1485_s8 }
  0x72   : > { %1221 = dma.done.wait (%p1591_p0), %s220_s26, 128  }
  0x73   : > { %1223 = vsyncadd (%p1591_p0), %s220_s26, 4294967168  ;;  %s228_s4 = sand.u32 1, %s1321_s18   ;;  %s232_s19 = scalar_lea.vmem [#allocation6], %s1485_s8 }
  0x74   : > { %s229_s11 = scalar_lea.sflag [#allocation7], %s228_s4 }
  0x75   : > { %1225 = dma.done.wait (%p1591_p0), %s229_s11, 256  }
  0x76   : > { %1227 = vsyncadd (%p1591_p0), %s229_s11, 4294967040  ;;  %v278_v0 = vld [vmem:[%s223_s16] sm:$0xff]  ;;  %v285_v6 = vld [vmem:[%s232_s19] sm:$0xff]  ;;  %s241_s18 = scalar_lea.vmem [#allocation8], %s1485_s8  ;;  %s1259_s24 = smov 96   ;;  %vm318_vm2 = vcmask 64512  }
  0x77   : > { %v281_v1 = vmin.f32 %v278_v0, 0.0  ;;  %v280_v3 = vadd.f32 1.0, %v278_v0  ;;  %vm279_vm0 = vcmp.gt.f32.partialorder %v278_v0, 0.0  ;;  %937 = vmatprep.subr.mxu0 %v285_v6  ;;  %v403_v7 = vld [vmem:[%s241_s18] sm:$0xff]  ;;  %s1260_s7 = smov 80   ;;  %s1261_s20 = smov 112  }
  0x78   : > { %938 = vmatpush3.msra.mxu0 %v285_v6  ;;  %v406_v8 = vmin.f32 %v403_v7, 0.0  ;;  %v405_v10 = vadd.f32 1.0, %v403_v7  ;;  %vm404_vm1 = vcmp.gt.f32.partialorder %v403_v7, 0.0  ;;  %v1262_v15 = vmov 0.0|0.0   ;;  %s1266_s10 = smov 8   ;;  %s1267_s6 = smov 16  }
  0x79   : > { %v282_v2 = vmul.f32 1.442695, %v281_v1  ;;  %970 = vmatprep.subr.bf16.mxu1 %v1262_v15  ;;  %973 = vmatprep.subr.bf16.mxu0 %v1262_v15  ;;  %vm1263_vm3 = vmmov 0   ;;  %v1264_v16 = vmov 0.0   ;;  %vm400_vm4 = vcmask 72704   ;;  %s1268_s9 = smov 24  }
  0x7a   : > { %v407_v9 = vmul.f32 1.442695, %v406_v8  ;;  %946 = vmatprep.mubr.msk.f32.mxu1 %vm1263_vm3, %v1264_v16  ;;  %vm412_vm5 = vcmask 130048   ;;  %v1265_v25 = vmov 8   ;;  %s919_s22 = sshll.u32 %s1246_s15, 7  ;;  %s273_s28 = scalar_lea.vmem [#allocation9], %s1485_s8 }
  0x7b   : > { %1066 = vpow2.f32 %v282_v2  ;;  %1064 = vset.pattern.permute.xlu1 %v1265_v25  ;;  %s774_s30 = sshll.u32 %s273_s28, 4  ;;  %vm755_vm6 = vcmask 195584   ;;  %vm757_vm7 = vcmask 261120   ;;  %s1517_s5 = scalar_lea.hbm %s1569_s3, %s919_s22  ;;  %s1519_s30 = int_to_ptr.vmem [resolvable:$true] %s774_s30 }
  0x7c   : > { %1068 = vpow2.f32 %v407_v9  ;;  %s760_s15 = scalar_lea.sflag [#allocation5], %s1482_s21  ;;  %s1168_s23 = scalar_lea.vmem %s1519_s30, 128 }
  0x7d   : > { %p1169_p4 = scmp.ne.s32.totalorder %s1519_s30, %s1168_s23  ;;  %p1592_p10 = scmp.ne.s32.totalorder %s1580_s25, 0 }
  0x7e   : > { %s1269_s8 = smov [#allocation9]  }
  0x7f   : > { %p1170_p12 = pnand %p1169_p4, %p1592_p10  ;;  %s1172_s26 = sshll.u32 %s1269_s8, 4  ;;  %s1173_s26 = int_to_ptr.vmem [resolvable:$false] %s1172_s26 }
  0x80   : > { %s1174_s16 = scalar_lea.vmem %s1173_s26, 256  ;;  %p1175_p8 = scmp.lt.s32.totalorder %s1519_s30, %s1173_s26 }
  0x81   : > { %p1171_p1 = pneg %p1170_p12  ;;  %p1176_p9 = scmp.lt.s32.totalorder %s1174_s16, %s1168_s23 }
  0x83   : > { %p1177_p6 = por %p1176_p9, %p1175_p8 }
  0x85   : > { %v1067_v4 = vpop.eup %1066  ;;  %p1178_p13 = pnand %p1177_p6, %p1171_p1 }
  0x86   : > { %v284_v5 = vsel %vm279_vm0, %v280_v3, %v1067_v4  ;;  %v1069_v11 = vpop.eup %1068 }
  0x87   : > { %286 = vxpose.xlu0.b32.start.end [1/1] (short) (narrow) %v284_v5, 16  ;;  %v409_v12 = vsel %vm404_vm1, %v405_v10, %v1069_v11 }
  0x88   : > { %576 = vrot.lane.b32.xlu1 %v409_v12, %s1259_s24 }
  0x8c   : > { %658 = vrot.lane.b32.xlu1 %v409_v12, %s1260_s7 }
  0xb0   : > { %1065 = vset.pattern.permute.xlu0 %v1265_v25 }
  0xb4   : > { %494 = vrot.lane.b32.xlu0 %v409_v12, %s1261_s20 }
  0xfa   : > { %v577_v22 = vpop.permute.xlu1 %576 }
  0xfe   : > { %v659_v24 = vpop.permute.xlu1 %658 }
 0x107   : > { %v302_v13 = vpop.trf.xlu0 }
 0x108   : > { %939 = vmatprep.mubr.msk.f32.mxu0 %vm318_vm2, %v302_v13 }
 0x10b   : > { %v303_v14 = vpop.trf.xlu0 }
 0x10c   : > { %940 = vmatmul.mubr.msk.f32.vlgmr.msra.gmra.mrb[0].mxu0 %vm318_vm2, %v303_v14 }
 0x10d   : > { %953 = vmatprep.mubr.msk.f32.mxu0 %vm1263_vm3, %v1264_v16 }
 0x126   : > { %v495_v23 = vpop.permute.xlu0 %494 }
 0x1df   : > { %v941_v17 = vpop.f32.mrb[0].mxu0 }
 0x1e0   : > { %402 = vst.msk [vmem:[#allocation2 + $0x8] sm:$0xff] %vm400_vm4, %v941_v17  ;;  %v391_v18 = vpop.f32.mrb[1].mxu0 }
 0x1e1   : > { %401 = vst.msk [vmem:[#allocation2] sm:$0xff] %vm400_vm4, %v391_v18 }
 0x1e7   : > { %v411_v19 = vld [vmem:[#allocation2 + $0x8] sm:$0xff] }
 0x1e8   : > { %v410_v20 = vld [vmem:[#allocation2] sm:$0xff] }
 0x1e9   : > { %v971_v21 = vpack.c.bf16 %v411_v19, %v410_v20 }
 0x1eb   : > { %972 = vmatpush3.bf16.msra.mxu1 %v971_v21  ;;  %975 = vmatpush3.bf16.msra.mxu0 %v971_v21 }
 0x1ec   : > { %976 = vmatprep.subr.bf16.mxu1 %v1262_v15  ;;  %979 = vmatprep.subr.bf16.mxu0 %v1262_v15 }
 0x1ee   : > { %947 = vmatmul.mubr.msk.f32.vlgmr.msra.gmra.mrb[0].mxu1 %vm412_vm5, %v409_v12  ;;  %954 = vmatmul.mubr.msk.f32.vlgmr.msra.gmra.mrb[2].mxu0 %vm412_vm5, %v495_v23 }
 0x1ef   : > { %978 = vmatpush3.bf16.msra.mxu1 %v971_v21  ;;  %981 = vmatpush3.bf16.msra.mxu0 %v971_v21 }
 0x1f0   : > { %960 = vmatprep.mubr.msk.f32.mxu1 %vm1263_vm3, %v1264_v16  ;;  %967 = vmatprep.mubr.msk.f32.mxu0 %vm1263_vm3, %v1264_v16 }
 0x1f2   : > { %961 = vmatmul.mubr.msk.f32.vlgmr.msra.gmra.mrb[2].mxu1 %vm412_vm5, %v577_v22  ;;  %968 = vmatmul.mubr.msk.f32.vlgmr.msra.gmra.mrb[4].mxu0 %vm412_vm5, %v659_v24 }
 0x2c1   : > { %v482_v26 = vpop.f32.mrb[0].mxu1  ;;  %v564_v27 = vpop.f32.mrb[2].mxu0 }
 0x2c2   : > { %v568_v28 = vadd.f32 1e-06, %v564_v27  ;;  %v948_v29 = vpop.f32.mrb[1].mxu1  ;;  %v955_v30 = vpop.f32.mrb[3].mxu0  ;;  %v486_v37 = vadd.f32 1e-06, %v482_v26 }
 0x2c4   : > { %1070 = vrcp.f32 %v568_v28 }
 0x2c5   : > { %v646_v31 = vpop.f32.mrb[2].mxu1  ;;  %v728_v32 = vpop.f32.mrb[4].mxu0 }
 0x2c6   : > { %v650_v33 = vadd.f32 1e-06, %v646_v31  ;;  %v962_v34 = vpop.f32.mrb[3].mxu1  ;;  %v969_v35 = vpop.f32.mrb[5].mxu0  ;;  %v732_v36 = vadd.f32 1e-06, %v728_v32 }
 0x2c8   : > { %1072 = vrcp.f32 %v650_v33 }
 0x2c9   : > { %1074 = vrcp.f32 %v732_v36 }
 0x2ca   : > { %1076 = vrcp.f32 %v486_v37 }
 0x2ce   : > { %v1071_v38 = vpop.eup %1070 }
 0x2cf   : > { %572 = vperm.xlu1 %1064, %v1071_v38  }
 0x2d2   : > { %v1073_v39 = vpop.eup %1072 }
 0x2d3   : > { %654 = vperm.xlu1 %1064, %v1073_v39   ;;  %v1075_v40 = vpop.eup %1074 }
 0x2d4   : > { %v1077_v41 = vpop.eup %1076 }
 0x2d7   : > { %736 = vperm.xlu1 %1064, %v1075_v40  }
 0x2db   : > { %490 = vperm.xlu1 %1064, %v1077_v41  }
 0x34e   : > { %v573_v42 = vpop.permute.xlu1 %572 }
 0x34f   : > { %v575_v43 = vmul.f32 %v573_v42, %v564_v27 }
 0x351   : > { %741 = vrot.lane.b32.xlu1 %v575_v43, %s1266_s10 }
 0x352   : > { %v655_v44 = vpop.permute.xlu1 %654 }
 0x353   : > { %v657_v45 = vmul.f32 %v655_v44, %v646_v31 }
 0x355   : > { %745 = vrot.lane.b32.xlu1 %v657_v45, %s1267_s6 }
 0x356   : > { %v737_v46 = vpop.permute.xlu1 %736 }
 0x357   : > { %v739_v47 = vmul.f32 %v737_v46, %v728_v32 }
 0x359   : > { %749 = vrot.lane.b32.xlu1 %v739_v47, %s1268_s9 }
 0x35a   : > { %v491_v48 = vpop.permute.xlu1 %490 }
 0x35b   : > { %v493_v51 = vmul.f32 %v491_v48, %v482_v26 }
 0x3c3   : > { %v742_v49 = vpop.permute.xlu1 %741 }
 0x3c4   : > { %v753_v52 = vsel %vm318_vm2, %v493_v51, %v742_v49 }
 0x3c7   : > { %v746_v50 = vpop.permute.xlu1 %745 }
 0x3c8   : > { %v754_v53 = vsel %vm412_vm5, %v753_v52, %v746_v50 }
 0x3cb   : > { %v750_v54 = vpop.permute.xlu1 %749 }
 0x3cc   : > { %v756_v55 = vsel %vm755_vm6, %v754_v53, %v750_v54 }
 0x3cd   : > { %758 = vst.msk [vmem:[%s273_s28] sm:$0xff] %vm757_vm7, %v756_v55 }
 0x3ce   : > { %1181 = shalt.err (!%p1178_p13)
}
 0x3cf   : > { %s1182_s21 = scalar_lea.hbm %s1517_s5, 128  ;;  %s1186_s19 = scalar_lea.hbm %s1569_s3, 256 }
 0x3d0   : > { %p1183_p11 = scmp.ne.s32.totalorder %s1517_s5, %s1182_s21  ;;  %p1187_p7 = scmp.lt.u32.totalorder %s1517_s5, %s1569_s3 }
 0x3d1   : > { %p1188_p3 = scmp.lt.u32.totalorder %s1186_s19, %s1182_s21  ;;  %p1190_p4 = scmp.lt.u32.totalorder %s1182_s21, %s1517_s5 }
 0x3d2   : > { %p1184_p2 = pnand %p1183_p11, %p1592_p10 }
 0x3d3   : > { %p1189_p0 = por %p1188_p3, %p1187_p7 }
 0x3d4   : > { %p1185_p5 = pneg %p1184_p2 }
 0x3d5   : > { %p1191_p12 = por %p1190_p4, %p1189_p0 }
 0x3d7   : > { %p1192_p1 = pnand %p1191_p12, %p1185_p5 }
 0x3d9   : > { %1195 = shalt.err (!%p1192_p1)
}
 0x3da   : > { %988 = dma.vmem_to_hbm [thread:$0]  (%p1592_p10), %s1519_s30, 128, %s1517_s5, %s760_s15  }
 0x3db PF: > { %s786_s7 = sand.u32 1, %s1234_s12   ;;  %p1593_p8 = scmp.ne.s32.totalorder %s1582_s27, 0 }
 0x3dc   : > { %p1594_p9 = scmp.ge.s32.totalorder %s1254_s17, 2  ;;  %s787_s20 = scalar_lea.sflag [#allocation5], %s786_s7 }
 0x3de   : > { %p1001_p6 = pnand %p1594_p9, %p1593_p8 }
 0x3e0   : > { %1229 = dma.done.wait (!%p1001_p6), %s787_s20, 128  }
 0x3e1   : > { %1231 = vsyncadd (!%p1001_p6), %s787_s20, 4294967168  ;;  %s22_s17 = sadd.s32 1, %s1254_s17   ;;  %s1595_s25 = sld [smem:[#allocation15_spill]] }
 0x3e2   : > { %p19_p13 = scmp.ge.s32.totalorder %s22_s17, 4   ;;  %s1596_s15 = sld [smem:[#allocation13_spill]] }
 0x3e3   : > { %s1597_s16 = sld [smem:[#allocation14_spill]]  ;;  %s1598_s12 = smov %s1238_s13 }
 0x3e4   : > { %s1599_s13 = smov %s1242_s14  ;;  %21 = sbr.rel (!%p19_p13) target bundleno = 10 (0xa), region = 105 }
 0x3e7   : > { %s1600_s14 = smov %s1595_s25 }
 0x3eb   :  { %792 = vsyncpa [#allocation4], 1 }
 0x3ec   :  { %794 = vsyncpa [#allocation4 + $0x1], 1 }
 0x3ed   :  { %795 = vsyncpa [#allocation7], 1 }
 0x3ee   :  { %797 = vsyncpa [#allocation7 + $0x1], 1 }
 0x3ef   :  { %798 = vsyncpa [#allocation5], 1 }
 0x3f0   :  { %800 = vsyncpa [#allocation5 + $0x1], 1 }

</bundles_post_ra>
